<compile_context>
chip_gen: v7x
topology: tpu7x:2x2x1
jax: 0.10.0
libtpu: 0.0.40
codegen_flags: <defaults>
</compile_context>

<pallas_src>
import functools

import jax
import jax.numpy as jnp
from jax.experimental import pallas as pl
from jax.experimental.pallas import tpu as pltpu


def _round_up(x, m):
    return ((x + m - 1) // m) * m


def _pick_tile(total, candidates):
    for c in candidates:
        if c <= total and total % c == 0:
            return c
    return total


# ----------------------------- Kernel 1 -------------------------------------
def attention_mix_kernel(att_ref, w_ref, agg_ref):
    # att: (bs, K) precomputed attention weights
    # w:   (K, d_tile) lane-dense tile of the flattened (pre-permuted) experts
    # agg: (bs, d_tile) attention-mixed weights
    agg_ref[...] = jnp.dot(att_ref[...], w_ref[...],
                           preferred_element_type=jnp.float32)


# ----------------------------- Kernel 2 (tap-stack scratch path) ------------
def cond_conv_kernel_scratch(x_ref, w_ref, b_ref, mask_ref,
                             y_ref, ps_ref, pss_ref, xs_ref, *,
                             kh, kw, Wp, L_out):
    # x:    (1, C, L_in)        padded + row-major-flattened sample
    # w:    (1, out_tile, T*C)  per-sample aggregated weights
    # b:    (1, out_tile, 1)    per-sample aggregated bias (f32)
    # mask: (1, L_out)          validity mask for BN stats (f32)
    # y:    (1, out_tile, L_out) "wide" conv output (junk cols dropped later)
    # xs:   (T*C, L_out)        per-sample tap stack (VMEM scratch)
    @pl.when(pl.program_id(1) == 0)
    def _build_taps():                       # built once per sample, reused
        xp = x_ref[0]                        # (C, L_in)
        taps = [xp[:, i * Wp + j: i * Wp + j + L_out]
                for i in range(kh) for j in range(kw)]
        xs_ref[...] = jnp.concatenate(taps, axis=0)

    acc = jnp.dot(w_ref[0], xs_ref[...],
                  preferred_element_type=jnp.float32)          # (out_tile, L_out)
    acc = acc + b_ref[0]                                       # f32 broadcast add
    y_ref[0] = acc.astype(y_ref.dtype)

    vacc = acc * mask_ref[...]                                  # masked valid cols
    ps_ref[0] = jnp.sum(vacc, axis=1, keepdims=True)
    pss_ref[0] = jnp.sum(vacc * vacc, axis=1, keepdims=True)


# ----------------------------- Kernel 2 (no-xs direct path) -----------------
def cond_conv_kernel_direct(x_ref, w_ref, b_ref, mask_ref,
                            y_ref, ps_ref, pss_ref, *,
                            kh, kw, Wp, C, L_out):
    # Accumulating kh*kw matmuls: no (T*C, L_out) tap stack in VMEM.
    xp = x_ref[0]                                               # (C, L_in)
    w = w_ref[0]                                                # (out_tile, T*C)
    acc = jnp.zeros((w.shape[0], L_out), jnp.float32)
    for i in range(kh):                                         # static unroll
        for j in range(kw):
            t = i * kw + j
            s = i * Wp + j
            acc = acc + jnp.dot(w[:, t * C:(t + 1) * C], xp[:, s:s + L_out],
                                preferred_element_type=jnp.float32)
    acc = acc + b_ref[0]
    y_ref[0] = acc.astype(y_ref.dtype)

    vacc = acc * mask_ref[...]
    ps_ref[0] = jnp.sum(vacc, axis=1, keepdims=True)
    pss_ref[0] = jnp.sum(vacc * vacc, axis=1, keepdims=True)


# ----------------------------- Kernel 3 -------------------------------------
def bn_relu_kernel(y_ref, scale_ref, shift_ref, o_ref):
    # y: (1, out_tile, L_out); scale/shift: (1, out_tile, 1) f32
    y = y_ref[0].astype(jnp.float32)
    o = y * scale_ref[0] + shift_ref[0]
    o_ref[0] = jnp.maximum(o, 0.0).astype(o_ref.dtype)


# ------------------------------ Wrapper -------------------------------------
def cond_conv_forward(x, attn_w, weight, bias, gamma, beta,
                      kernel_size=(3, 3), padding=(1, 1),
                      conv_dtype=jnp.float32, out_dtype=jnp.float32,
                      force_direct=False):
    bs, C, H, W = x.shape
    kh, kw = kernel_size
    ph, pw = padding
    K, out_p = bias.shape
    T = kh * kw
    TC = T * C                                  # contraction length

    Hp, Wp = H + 2 * ph, W + 2 * pw
    # stride=1 "same"-size output is what the PyTorch module's .view implies.
    assert Hp - kh + 1 == H and Wp - kw + 1 == W, "only stride=1 same-size supported"

    L_out = _round_up(H * Wp, 128)                               # lane-dense wide out
    L_in = _round_up(max(Hp * Wp, (kh - 1) * Wp + (kw - 1) + L_out), 128)
    out_p_pad = _round_up(out_p, 8)                              # sublane-aligned

    # --- Attention (pool -> 1x1 conv -> sigmoid): tiny, done once in XLA.
    pooled = jnp.mean(x, axis=(2, 3)).astype(jnp.float32)        # (bs, C)
    att = jax.nn.sigmoid(pooled @ attn_w.T.astype(jnp.float32))  # (bs, K)

    # --- Expert weights: permute to kernel-2 tap order (kh, kw, C), pad out
    #     channels to a sublane multiple, flatten, and pad the flat dim to a
    #     multiple of 128 so kernel-1 tiles are always lane-dense.
    w_perm = jnp.transpose(weight, (0, 1, 3, 4, 2)).reshape(K, out_p, TC)
    w_perm = jnp.pad(w_perm, ((0, 0), (0, out_p_pad - out_p), (0, 0)))
    Dflat = out_p_pad * TC
    Dpad = _round_up(Dflat, 128)
    w_flat = jnp.pad(w_perm.reshape(K, Dflat),
                     ((0, 0), (0, Dpad - Dflat))).astype(jnp.float32)

    # --- Kernel 1: expert mixing, streamed over lane-dense D tiles.
    d_tile = Dpad if Dpad <= 8192 else _pick_tile(
        Dpad, (8192, 4096, 2048, 1024, 512, 256, 128))
    agg = pl.pallas_call(
        attention_mix_kernel,
        out_shape=jax.ShapeDtypeStruct((bs, Dpad), jnp.float32),
        grid=(Dpad // d_tile,),
        in_specs=[
            pl.BlockSpec((bs, K), lambda d: (0, 0)),
            pl.BlockSpec((K, d_tile), lambda d: (0, d)),
        ],
        out_specs=pl.BlockSpec((bs, d_tile), lambda d: (0, d)),
        compiler_params=pltpu.CompilerParams(dimension_semantics=("parallel",)),
    )(att, w_flat)
    agg3 = agg[:, :Dflat].reshape(bs, out_p_pad, TC).astype(conv_dtype)

    # --- Aggregated expert bias, kept at f32, added post-matmul in kernel 2.
    bias_pad = jnp.pad(bias, ((0, 0), (0, out_p_pad - out_p))).astype(jnp.float32)
    agg_b = (att @ bias_pad).reshape(bs, out_p_pad, 1)

    # --- Padded, row-major-flattened activations (single cheap pad/reshape).
    xp = jnp.pad(x, ((0, 0), (0, 0), (ph, ph), (pw, pw)))
    xpf = xp.reshape(bs, C, Hp * Wp)
    xpf = jnp.pad(xpf, ((0, 0), (0, 0), (0, L_in - Hp * Wp))).astype(conv_dtype)

    # --- Grid-invariant validity mask for the BN-stats epilogue.
    col = jnp.arange(L_out, dtype=jnp.int32)
    mask = jnp.logical_and((col % Wp) < W, col < H * Wp)
    mask = mask.astype(jnp.float32).reshape(1, L_out)

    out_tile = _pick_tile(out_p_pad, (256, 128, 64, 32, 16, 8))
    n_ot = out_p_pad // out_tile

    # --- VMEM budget for kernel 2 (double-buffered blocks + tap scratch).
    y_dtype = conv_dtype                       # bf16 y_wide on the bf16 path
    itemsize = jnp.dtype(conv_dtype).itemsize
    y_itemsize = jnp.dtype(y_dtype).itemsize
    tap_bytes = TC * L_out * itemsize
    use_scratch = (not force_direct) and (tap_bytes <= 4 * 2 ** 20)
    est = 2 * (C * L_in * itemsize + out_tile * TC * itemsize
               + out_tile * 4 + L_out * 4
               + out_tile * L_out * y_itemsize + 2 * out_tile * 4)
    if use_scratch:
        est += tap_bytes
    vmem_limit = int(min(64 * 2 ** 20, max(32 * 2 ** 20, 2 * est)))

    in_specs2 = [
        pl.BlockSpec((1, C, L_in), lambda b, o: (b, 0, 0)),
        pl.BlockSpec((1, out_tile, TC), lambda b, o: (b, o, 0)),
        pl.BlockSpec((1, out_tile, 1), lambda b, o: (b, o, 0)),
        pl.BlockSpec((1, L_out), lambda b, o: (0, 0)),
    ]
    out_specs2 = (
        pl.BlockSpec((1, out_tile, L_out), lambda b, o: (b, o, 0)),
        pl.BlockSpec((1, out_tile, 1), lambda b, o: (b, o, 0)),
        pl.BlockSpec((1, out_tile, 1), lambda b, o: (b, o, 0)),
    )
    out_shapes2 = (
        jax.ShapeDtypeStruct((bs, out_p_pad, L_out), y_dtype),
        jax.ShapeDtypeStruct((bs, out_p_pad, 1), jnp.float32),
        jax.ShapeDtypeStruct((bs, out_p_pad, 1), jnp.float32),
    )

    # --- Kernel 2: per-sample conv as MXU matmul(s) + partial BN stats.
    if use_scratch:
        kern2 = functools.partial(cond_conv_kernel_scratch,
                                  kh=kh, kw=kw, Wp=Wp, L_out=L_out)
        y_wide, psum, psumsq = pl.pallas_call(
            kern2, out_shape=out_shapes2, grid=(bs, n_ot),
            in_specs=in_specs2, out_specs=out_specs2,
            scratch_shapes=[pltpu.VMEM((TC, L_out), conv_dtype)],
            compiler_params=pltpu.CompilerParams(
                dimension_semantics=("parallel", "arbitrary"),
                vmem_limit_bytes=vmem_limit),
        )(xpf, agg3, agg_b, mask)
    else:
        kern2 = functools.partial(cond_conv_kernel_direct,
                                  kh=kh, kw=kw, Wp=Wp, C=C, L_out=L_out)
        y_wide, psum, psumsq = pl.pallas_call(
            kern2, out_shape=out_shapes2, grid=(bs, n_ot),
            in_specs=in_specs2, out_specs=out_specs2,
            compiler_params=pltpu.CompilerParams(
                dimension_semantics=("parallel", "parallel"),
                vmem_limit_bytes=vmem_limit),
        )(xpf, agg3, agg_b, mask)

    # --- Finalize global (training-mode) BN statistics from the partial sums.
    #     NOTE: matches PyTorch BatchNorm2d in training mode (biased variance);
    #     eval-mode running statistics are not modeled.
    n = bs * H * W
    mean = jnp.sum(psum, axis=(0, 2)) / n                        # (out_p_pad,)
    ex2 = jnp.sum(psumsq, axis=(0, 2)) / n
    var = jnp.maximum(ex2 - mean * mean, 0.0)
    inv = jax.lax.rsqrt(var + 1e-5)
    gamma_pad = jnp.pad(gamma.astype(jnp.float32), (0, out_p_pad - out_p))
    beta_pad = jnp.pad(beta.astype(jnp.float32), (0, out_p_pad - out_p))
    scale = (gamma_pad * inv).reshape(1, out_p_pad, 1)
    shift = (beta_pad - mean * gamma_pad * inv).reshape(1, out_p_pad, 1)

    # --- Kernel 3: tiled normalize + ReLU.
    o_wide = pl.pallas_call(
        bn_relu_kernel,
        out_shape=jax.ShapeDtypeStruct((bs, out_p_pad, L_out), out_dtype),
        grid=(bs, n_ot),
        in_specs=[
            pl.BlockSpec((1, out_tile, L_out), lambda b, o: (b, o, 0)),
            pl.BlockSpec((1, out_tile, 1), lambda b, o: (0, o, 0)),
            pl.BlockSpec((1, out_tile, 1), lambda b, o: (0, o, 0)),
        ],
        out_specs=pl.BlockSpec((1, out_tile, L_out), lambda b, o: (b, o, 0)),
        compiler_params=pltpu.CompilerParams(
            dimension_semantics=("parallel", "parallel")),
    )(y_wide, scale, shift)

    # --- Drop the wide/padded junk columns + padded channels, back to NCHW.
    o = o_wide[:, :out_p, :H * Wp].reshape(bs, out_p, H, Wp)[:, :, :, :W]
    return o


# --------------------------- Pure-JAX reference ------------------------------
def cond_conv_reference(x, attn_w, weight, bias, gamma, beta,
                        kernel_size=(3, 3), padding=(1, 1)):
    bs, C, H, W = x.shape
    kh, kw = kernel_size
    K, out_p = bias.shape
    pooled = jnp.mean(x, axis=(2, 3))                             # (bs, C)
    att = jax.nn.sigmoid(pooled @ attn_w.T)                       # (bs, K)
    agg_w = (att @ weight.reshape(K, -1)).reshape(bs * out_p, C, kh, kw)
    agg_b = (att @ bias).reshape(-1)                              # (bs*out,)
    lhs = x.reshape(1, bs * C, H, W)
    y = jax.lax.conv_general_dilated(
        lhs, agg_w, window_strides=(1, 1),
        padding=[(padding[0], padding[0]), (padding[1], padding[1])],
        feature_group_count=bs,
        dimension_numbers=('NCHW', 'OIHW', 'NCHW'))
    y = y + agg_b[None, :, None, None]
    y = y.reshape(bs, out_p, H, W)
    mean = jnp.mean(y, axis=(0, 2, 3), keepdims=True)
    var = jnp.mean((y - mean) ** 2, axis=(0, 2, 3), keepdims=True)
    yhat = (y - mean) * jax.lax.rsqrt(var + 1e-5)
    o = yhat * gamma[None, :, None, None] + beta[None, :, None, None]
    return jnp.maximum(o, 0.0)


if __name__ == "__main__":
    # Small deterministic config: bs=2, in_planes=4, out_planes=8, 3x3 conv,
    # stride=1, padding=(1,1), num_exp=4, 16x16 spatial.
    bs, C, H, W = 2, 4, 16, 16
    out_p, K = 8, 4
    kh, kw = 3, 3

    key = jax.random.PRNGKey(0)
    k1, k2, k3, kx = jax.random.split(key, 4)

    # Attention 1x1 conv weight (kaiming_normal, fan_out=K, relu gain).
    attn_w = jax.random.normal(k1, (K, C), jnp.float32) * jnp.sqrt(2.0 / K)
    # Expert conv weights (kaiming_uniform-style bound).
    fan_in = C * kh * kw
    bound = (6.0 / fan_in) ** 0.5
    weight = jax.random.uniform(k2, (K, out_p, C, kh, kw), jnp.float32,
                                minval=-bound, maxval=bound)
    # Expert biases (torch.randn).
    bias = jax.random.normal(k3, (K, out_p), jnp.float32)
    # BatchNorm affine params (default init).
    gamma = jnp.ones((out_p,), jnp.float32)
    beta = jnp.zeros((out_p,), jnp.float32)

    x = jax.random.normal(kx, (bs, C, H, W), jnp.float32)

    ref = jax.block_until_ready(
        cond_conv_reference(x, attn_w, weight, bias, gamma, beta,
                            kernel_size=(kh, kw), padding=(1, 1)))

    # f32 path, tap-stack-scratch kernel (default).
    out = cond_conv_forward(x, attn_w, weight, bias, gamma, beta,
                            kernel_size=(kh, kw), padding=(1, 1),
                            conv_dtype=jnp.float32)
    out = jax.block_until_ready(out)
    assert out.shape == (bs, out_p, H, W)
    assert jnp.allclose(out, ref, atol=1e-3, rtol=1e-3), (
        f"f32 max abs err = {float(jnp.max(jnp.abs(out - ref)))}")

    # f32 path, direct (no tap-stack) kernel used for large C*H*W problems.
    out_d = cond_conv_forward(x, attn_w, weight, bias, gamma, beta,
                              kernel_size=(kh, kw), padding=(1, 1),
                              conv_dtype=jnp.float32, force_direct=True)
    out_d = jax.block_until_ready(out_d)
    assert jnp.allclose(out_d, ref, atol=1e-3, rtol=1e-3), (
        f"f32-direct max abs err = {float(jnp.max(jnp.abs(out_d - ref)))}")

    # bf16 MXU-input path (recommended on v6e/v7x): f32 accumulation + f32
    # bias/BN-stats, bf16 wide-output round trip, looser tolerance.
    out_bf16 = cond_conv_forward(x, attn_w, weight, bias, gamma, beta,
                                 kernel_size=(kh, kw), padding=(1, 1),
                                 conv_dtype=jnp.bfloat16)
    out_bf16 = jax.block_until_ready(out_bf16)
    assert jnp.allclose(out_bf16, ref, atol=5e-2, rtol=5e-2), (
        f"bf16 max abs err = {float(jnp.max(jnp.abs(out_bf16 - ref)))}")

    print("KERNEL_OK")
</pallas_src>

<mosaic_0001>
module attributes {stable_mosaic.version = 11 : i64} {
  func.func @attention_mix_kernel(%arg0: i32, %arg1: memref<2x4xf32, #tpu.memory_space<vmem>>, %arg2: memref<4x384xf32, #tpu.memory_space<vmem>>, %arg3: memref<2x384xf32, #tpu.memory_space<vmem>>) attributes {dimension_semantics = [#tpu.dimension_semantics<parallel>], iteration_bounds = array<i64: 1>, scalar_prefetch = 0 : i64, scratch_operands = 0 : i64, tpu.core_type = #tpu.core_type<tc>, window_params = [{pipeline_mode = #tpu.pipeline_mode<synchronous>, transform_indices = @transform_0, window_bounds = array<i64: 2, 4>}, {transform_indices = @transform_1, window_bounds = array<i64: 4, 384>}, {transform_indices = @transform_2, window_bounds = array<i64: 2, 384>}]} {
    %c0 = arith.constant 0 : index
    %c0_0 = arith.constant 0 : index
    %0 = vector.load %arg1[%c0, %c0_0] : memref<2x4xf32, #tpu.memory_space<vmem>>, vector<2x4xf32>
    %c0_1 = arith.constant 0 : index
    %c0_2 = arith.constant 0 : index
    %1 = vector.load %arg2[%c0_1, %c0_2] : memref<4x384xf32, #tpu.memory_space<vmem>>, vector<4x384xf32>
    %cst = arith.constant dense<0.000000e+00> : vector<2x384xf32>
    %2 = tpu.matmul %0, %1, %cst {dimension_numbers = #tpu.dot_dimension_numbers<[1], [0], [0], [1], [0, 0, 1, 1], [], []>} : vector<2x4xf32>, vector<4x384xf32>, vector<2x384xf32> -> vector<2x384xf32>
    %c0_3 = arith.constant 0 : index
    %c0_4 = arith.constant 0 : index
    %3 = vector.load %arg3[%c0_3, %c0_4] : memref<2x384xf32, #tpu.memory_space<vmem>>, vector<2x384xf32>
    tpu.vector_store %arg3[%c0_3, %c0_4], %2 {strides = array<i32>} : memref<2x384xf32, #tpu.memory_space<vmem>>, vector<2x384xf32>,
    return
  }
  func.func @transform_0(%arg0: i32) -> (i32, i32) {
    %c0_i32 = arith.constant 0 : i32
    %c0_i32_0 = arith.constant 0 : i32
    %c0_i32_1 = arith.constant 0 : i32
    return %c0_i32, %c0_i32_0 : i32, i32
  }
  func.func @transform_1(%arg0: i32) -> (i32, i32) {
    %c0_i32 = arith.constant 0 : i32
    %c0_i32_0 = arith.constant 0 : i32
    return %c0_i32, %arg0 : i32, i32
  }
  func.func @transform_2(%arg0: i32) -> (i32, i32) {
    %c0_i32 = arith.constant 0 : i32
    %c0_i32_0 = arith.constant 0 : i32
    return %c0_i32, %arg0 : i32, i32
  }
}

</mosaic_0001>

<bundles_post_ra>
// kernel: tpu_custom_call.1
= control target key start
LH: loop header
LB: loop body
LE: loop exit
PB: predicated region body
PF: predicated region fallthrough
CT: control target
= control target key end

     0   :  { %7 = vsyncpa [#allocation3], 0  ;;  %s379_s0 = inlined_call_operand.hbm [shape: f32[2,4], index: 0, kind: input, shape index: {}]   ;;  %s380_s1 = inlined_call_operand.hbm [shape: f32[4,384], index: 1, kind: input, shape index: {}]   ;;  %s381_s2 = inlined_call_operand.hbm [shape: f32[2,384], index: 2, kind: output, shape index: {}]  }
   0x1   :  { %8 = vsyncpa [#allocation6], 0 }
   0x2   :  { %9 = vsyncpa [#allocation4], 0  ;;  %s322_s9 = smov [#allocation2]   ;;  %s323_s11 = smov [#allocation5]  }
   0x3   :  { %s16_s10 = sshll.u32 %s322_s9, 4  ;;  %s26_s12 = sshll.u32 %s323_s11, 4  ;;  %s17_s10 = int_to_ptr.vmem [resolvable:$true] %s16_s10  ;;  %s27_s12 = int_to_ptr.vmem [resolvable:$true] %s26_s12 }
   0x4   :  { %s250_s15 = scalar_lea.hbm %s379_s0, 32 }
   0x5   :  { %p251_p0 = scmp.ne.s32.totalorder %s379_s0, %s250_s15  ;;  %p254_p1 = scmp.lt.u32.totalorder %s250_s15, %s379_s0 }
   0x7   :  { %p256_p2 = pnand %p254_p1, %p251_p0 }
   0x9   :  { %259 = shalt.err (!%p256_p2)
}
   0xa   :  { %s260_s20 = scalar_lea.vmem %s17_s10, 32  ;;  %p265_p4 = scmp.lt.s32.totalorder %s17_s10, %s17_s10 }
   0xb   :  { %p261_p3 = scmp.ne.s32.totalorder %s17_s10, %s260_s20  ;;  %p266_p5 = scmp.lt.s32.totalorder %s260_s20, %s260_s20 }
   0xd   :  { %p267_p6 = por %p266_p5, %p265_p4 }
   0xf   :  { %p268_p7 = pnand %p267_p6, %p261_p3 }
  0x11   :  { %271 = shalt.err (!%p268_p7)
}
  0x12   :  { %19 = dma.hbm_to_vmem [thread:$0]  %s379_s0, 32, %s17_s10, [#allocation3]  }
  0x13   :  { %s272_s25 = scalar_lea.hbm %s380_s1, 192 }
  0x14   :  { %p273_p8 = scmp.ne.s32.totalorder %s380_s1, %s272_s25  ;;  %p276_p9 = scmp.lt.u32.totalorder %s272_s25, %s380_s1 }
  0x16   :  { %p278_p10 = pnand %p276_p9, %p273_p8 }
  0x18   :  { %281 = shalt.err (!%p278_p10)
}
  0x19   :  { %s282_s30 = scalar_lea.vmem %s27_s12, 192  ;;  %p287_p12 = scmp.lt.s32.totalorder %s27_s12, %s27_s12 }
  0x1a   :  { %p283_p11 = scmp.ne.s32.totalorder %s27_s12, %s282_s30  ;;  %p288_p13 = scmp.lt.s32.totalorder %s282_s30, %s282_s30 }
  0x1c   :  { %p289_p0 = por %p288_p13, %p287_p12 }
  0x1e   :  { %p290_p1 = pnand %p289_p0, %p283_p11 }
  0x20   :  { %293 = shalt.err (!%p290_p1)
}
  0x21   :  { %29 = dma.hbm_to_vmem [thread:$0]  %s380_s1, 192, %s27_s12, [#allocation6]  }
  0x22   :  { %316 = dma.done.wait [#allocation3], 32  }
  0x23   :  { %317 = vsyncadd [#allocation3], 4294967264 }
  0x24   :  { %318 = dma.done.wait [#allocation6], 192  }
  0x25   :  { %319 = vsyncadd [#allocation6], 4294967104  ;;  %v324_v0 = vmov 0.0   ;;  %vm325_vm0 = vmmov 0   ;;  %v37_v1 = vld [vmem:[#allocation5] sm:$0xff]  ;;  %vm46_vm1 = vcmask 1043456   ;;  %v201_v7 = vlaneseq }
  0x26   :  { %117 = vmatprep.mubr.f32.mxu0 %v324_v0  ;;  %238 = vmatprep.subr.mxu1 %v324_v0  ;;  %v38_v2 = vld [vmem:[#allocation5 + $0x8] sm:$0xf]  ;;  %v41_v3 = vcombine.high %v37_v1, %v37_v1  ;;  %v36_v4 = vld [vmem:[#allocation2] sm:$0x3]  ;;  %vm42_vm2 = vcmask 31744   ;;  %s327_s1 = smov [#allocation7]  }
  0x27   :  { %240 = vmatprep.mubr.msk.f32.mxu1 %vm325_vm0, %v324_v0  ;;  %239 = vmatpush3.msk.msra.mxu1 %vm46_vm1, %v38_v2  ;;  %v326_v5 = vmov 1983009808   ;;  %v202_v9 = vshrl.u32 %v201_v7, 7  ;;  %s221_s4 = sshll.u32 %s327_s1, 4  ;;  %s222_s4 = int_to_ptr.vmem [resolvable:$true] %s221_s4 }
  0x28   :  { %241 = vmatmul.mubr.msk.f32.vlgmr.msra.gmra.mrb[0].mxu1 %vm42_vm2, %v36_v4  ;;  %231 = vmatprep.subr.msk.mxu0 %vm46_vm1, %v41_v3  ;;  %v199_v6 = vunpack.c.l.s4 %v326_v5  ;;  %s294_s5 = scalar_lea.vmem %s222_s4, 96  ;;  %p299_p3 = scmp.lt.s32.totalorder %s222_s4, %s222_s4 }
  0x29   :  { %232 = vmatpush1.msk.msra.mxu0 %vm46_vm1, %v37_v1  ;;  %p295_p2 = scmp.ne.s32.totalorder %s222_s4, %s294_s5  ;;  %p300_p4 = scmp.lt.s32.totalorder %s294_s5, %s294_s5 }
  0x2a   :  { %233 = vmatmul.mubr.msk.f32.vlgmr.msra.gmra.mrb[0].mxu0 %vm42_vm2, %v36_v4  ;;  %v200_v8 = vunpack.c.0.s8 %v199_v6 }
  0x2b   :  { %p301_p5 = por %p300_p4, %p299_p3 }
  0x2c   :  { %v203_v11 = vsub.s32 %v200_v8, %v202_v9 }
  0x2d   :  { %p302_p6 = pnand %p301_p5, %p295_p2 }
  0xfb   :  { %v190_v10 = vpop.f32.mrb[0].mxu1 }
  0xfc   :  { %v242_v12 = vpop.f32.mrb[1].mxu1  ;;  %v211_v16 = vrot.slane %v190_v10, %v203_v11 }
  0xfd   :  { %v119_v13 = vpop.f32.mrb[0].mxu0 }
  0xfe   :  { %v121_v14 = vpop.f32.mrb[1].mxu0 }
  0xff   :  { %v197_v15 = vcombine.low %v119_v13, %v121_v14 }
 0x101   :  { %v204_v17 = vrot.slane %v197_v15, %v203_v11 }
 0x103   :  { %v212_v18 = vcombine.low %v204_v17, %v211_v16 }
 0x105   :  { %214 = vst [vmem:[#allocation7] sm:$0x3f] %v212_v18 }
 0x106   :  { %305 = shalt.err (!%p302_p6)
}
 0x107   :  { %s306_s8 = scalar_lea.hbm %s381_s2, 96 }
 0x108   :  { %p307_p7 = scmp.ne.s32.totalorder %s381_s2, %s306_s8  ;;  %p310_p8 = scmp.lt.u32.totalorder %s306_s8, %s381_s2 }
 0x10a   :  { %p312_p9 = pnand %p310_p8, %p307_p7 }
 0x10c   :  { %315 = shalt.err (!%p312_p9)
}
 0x10d   :  { %224 = dma.vmem_to_hbm [thread:$0]  %s222_s4, 96, %s381_s2, [#allocation4]  }
 0x10e   :  { %320 = dma.done.wait [#allocation4], 96  }
 0x10f   :  { %321 = vsyncadd [#allocation4], 4294967200 }
 0x110   :  { %228 = vsyncpa [#allocation3], 1 }
 0x111   :  { %229 = vsyncpa [#allocation6], 1 }
 0x112   :  { %230 = vsyncpa [#allocation4], 1 }

</bundles_post_ra>
